<compile_context>
chip_gen: v7x
topology: tpu7x:2x2x1
jax: 0.10.0
libtpu: 0.0.40
codegen_flags: <defaults>
</compile_context>

<pallas_src>
import functools

import jax
import jax.numpy as jnp
from jax.experimental import pallas as pl
from jax.experimental.pallas import tpu as pltpu


def _aft_full_kernel(ep_ref, x_ref, wqkv_ref, bqkv_ref, o_ref,
                     rhs_ref, sq_ref, *, tq, dp, ep_resident, approx_recip):
    """Grid = (batch, query_tile).

    At t == 0 one fused (n, d) @ (d, 3*dp) projection produces [q | k | v];
    sigmoid(q) and the max-stabilised [exp(k)*v | exp(k)] are written to
    persistent VMEM scratch.  Every query tile then runs a single fused
    (tq, n) @ (n, 2*dp) MXU pass and an elementwise epilogue.
    """
    t = pl.program_id(1)

    # ---- once per batch element: fused Q/K/V projection ---------------------
    @pl.when(t == 0)
    def _():
        qkv = jnp.dot(x_ref[...], wqkv_ref[...],
                      preferred_element_type=jnp.float32) + bqkv_ref[...]
        q = qkv[:, :dp]
        k = qkv[:, dp:2 * dp]
        v = qkv[:, 2 * dp:]
        sq_ref[...] = jax.nn.sigmoid(q)                       # (n, dp) f32
        # exp(-k_max) cancels exactly in numerator/denominator -> stable, exact.
        k_max = jnp.max(k, axis=0, keepdims=True)             # (1, dp)
        ek = jnp.exp(k - k_max)                                # (n, dp) <= 1
        rhs_ref[:, :dp] = (ek * v).astype(rhs_ref.dtype)       # lane-aligned
        rhs_ref[:, dp:] = ek.astype(rhs_ref.dtype)             # direct stores

    # ---- per query tile ------------------------------------------------------
    i0 = t * tq
    if tq % 8 == 0:
        i0 = pl.multiple_of(i0, 8)

    if ep_resident and ep_ref.shape[0] != tq:
        ep = ep_ref[pl.ds(i0, tq), :]
    else:
        ep = ep_ref[...]
    sq = sq_ref[...] if sq_ref.shape[0] == tq else sq_ref[pl.ds(i0, tq), :]

    # Fused numerator/denominator: exp(pos_tile) @ [exp(k)*v | exp(k)]
    nd = jnp.dot(ep, rhs_ref[...], preferred_element_type=jnp.float32)
    num = nd[:, :dp]
    den = nd[:, dp:]
    if approx_recip:
        ratio = num * pl.reciprocal(den, approx=True)
    else:
        ratio = num / den
    o_ref[...] = (sq * ratio).astype(o_ref.dtype)


@functools.partial(jax.jit, static_argnames=("tq", "use_bf16", "resident_ep"))
def aft_full_forward(x, wq, bq, wk, bk, wv, bv, pos, *,
                     tq=None, use_bf16=False, resident_ep=None):
    bs, n, d = x.shape
    dp = d if d % 128 == 0 else (-(-d // 128)) * 128          # lane-pad d -> dp
    if tq is None:
        if n % 256 == 0 and n > 256:
            tq = 256
        elif n % 128 == 0 and n > 128:
            tq = 128
        else:
            tq = n
    assert n % tq == 0 and (tq == n or tq % 8 == 0), (n, tq)
    cd = jnp.bfloat16 if use_bf16 else jnp.float32
    cbytes = 2 if use_bf16 else 4
    obytes = jnp.dtype(x.dtype).itemsize

    # exp(pos) fully VMEM-resident (DMA'd once) when small enough to be safe
    # on every generation (incl. v7x's 64 MiB VMEM); else streamed per tile.
    if resident_ep is None:
        resident_ep = (n * n * cbytes) <= (8 << 20)

    # ---- batch-invariant prep hoisted out of the grid loop ------------------
    # Row-max subtraction on pos is exact (cancels in num/den), avoids overflow.
    ep = jnp.exp(pos - jnp.max(pos, axis=1, keepdims=True)).astype(cd)   # (n, n)

    def pad_cols(w):          # (d, d) -> (d, dp): zero-pad output columns
        return w if dp == d else jnp.pad(w, ((0, 0), (0, dp - d)))

    def pad_bias(b):
        b = b.reshape(1, d)
        return b if dp == d else jnp.pad(b, ((0, 0), (0, dp - d)))

    # Pre-transposed, fused & lane-padded projection: (d, 3*dp) / (1, 3*dp).
    wqkv_t = jnp.concatenate(
        [pad_cols(wq.T), pad_cols(wk.T), pad_cols(wv.T)], axis=1).astype(cd)
    bqkv = jnp.concatenate(
        [pad_bias(bq), pad_bias(bk), pad_bias(bv)], axis=1).astype(jnp.float32)
    x_c = x.astype(cd)        # cast once here; no per-tile VPU casts in-kernel

    # ---- VMEM budget ---------------------------------------------------------
    ep_bytes = (2 * n * n * cbytes) if resident_ep else (2 * tq * n * cbytes)
    block_bytes = (
        ep_bytes
        + 2 * n * d * cbytes              # x, one batch row (double-buffered)
        + 2 * d * 3 * dp * cbytes         # [Wq^T | Wk^T | Wv^T]
        + 2 * 3 * dp * 4                  # fused bias
        + 2 * tq * dp * obytes            # out tile
        + n * 2 * dp * cbytes             # rhs scratch  [ek*v | ek]
        + n * dp * 4)                     # sigmoid(q) scratch
    try:
        vmem_cap = int(pltpu.get_tpu_info().vmem_capacity_bytes)
    except Exception:
        vmem_cap = 64 << 20               # conservative (v7x) fallback
    vmem_limit = int(min(max(block_bytes + (8 << 20), 32 << 20),
                         vmem_cap - (16 << 20)))

    cost = pl.CostEstimate(
        flops=bs * (2 * n * d * 3 * dp + 4 * n * n * dp),
        transcendentals=3 * bs * n * dp,
        bytes_accessed=(bs * n * d * cbytes
                        + (n * n * cbytes if resident_ep else bs * n * n * cbytes)
                        + 3 * d * dp * cbytes
                        + bs * n * dp * obytes),
    )

    kernel = functools.partial(_aft_full_kernel, tq=tq, dp=dp,
                               ep_resident=resident_ep, approx_recip=use_bf16)
    const2d = lambda b, t: (0, 0)
    ep_spec = (pl.BlockSpec((n, n), const2d) if resident_ep
               else pl.BlockSpec((tq, n), lambda b, t: (t, 0)))

    out = pl.pallas_call(
        kernel,
        out_shape=jax.ShapeDtypeStruct((bs, n, dp), x.dtype),
        grid=(bs, n // tq),
        in_specs=[
            ep_spec,                                             # exp(pos)
            pl.BlockSpec((None, n, d), lambda b, t: (b, 0, 0)),  # x, one batch
            pl.BlockSpec((d, 3 * dp), const2d),                  # fused W^T
            pl.BlockSpec((1, 3 * dp), const2d),                  # fused bias
        ],
        out_specs=pl.BlockSpec((None, tq, dp), lambda b, t: (b, t, 0)),
        scratch_shapes=[pltpu.VMEM((n, 2 * dp), cd),             # [ek*v | ek]
                        pltpu.VMEM((n, dp), jnp.float32)],       # sigmoid(q)
        compiler_params=pltpu.CompilerParams(
            dimension_semantics=("parallel", "arbitrary"),
            vmem_limit_bytes=vmem_limit),
        cost_estimate=cost,
    )(ep, x_c, wqkv_t, bqkv)
    return out if dp == d else out[..., :d]


def _reference(x, wq, bq, wk, bk, wv, bv, pos):
    # Plain-JAX transcription of the torch forward (for verification).
    q = x @ wq.T + bq
    k = x @ wk.T + bk
    v = x @ wv.T + bv
    w = jnp.exp(k[None, :, :, :] + pos[:, None, :, None])  # (n_q, bs, n_k, d)
    num = jnp.sum(w * v[None, :, :, :], axis=2)
    den = jnp.sum(w, axis=2)
    out = num / den                                         # (n, bs, d)
    return jax.nn.sigmoid(q) * jnp.transpose(out, (1, 0, 2))


if __name__ == "__main__":
    # Small, module-consistent shapes; n=16 with tq=8 exercises the multi-tile
    # query axis and the once-per-batch fused projection. d=32 exercises the
    # lane-padding (dp=128) path.
    bs, n, d_model = 2, 16, 32
    tq = 8

    key = jax.random.PRNGKey(0)
    kx, kq, kk, kv, kp = jax.random.split(key, 5)

    x = jax.random.normal(kx, (bs, n, d_model), dtype=jnp.float32)

    # nn.Linear init from the module: weight ~ N(0, 0.001), bias = 0.
    wq = 0.001 * jax.random.normal(kq, (d_model, d_model), dtype=jnp.float32)
    wk = 0.001 * jax.random.normal(kk, (d_model, d_model), dtype=jnp.float32)
    wv = 0.001 * jax.random.normal(kv, (d_model, d_model), dtype=jnp.float32)
    bq = jnp.zeros((d_model,), dtype=jnp.float32)
    bk = jnp.zeros((d_model,), dtype=jnp.float32)
    bv = jnp.zeros((d_model,), dtype=jnp.float32)

    # position_biases is a learned nn.Parameter; use random values for a
    # stronger functional check than the all-ones init.
    pos = jax.random.normal(kp, (n, n), dtype=jnp.float32)

    ref = _reference(x, wq, bq, wk, bk, wv, bv, pos)

    # Precise path (f32 MXU, exact division, resident exp(pos)).
    out = aft_full_forward(x, wq, bq, wk, bk, wv, bv, pos, tq=tq, use_bf16=False)
    out = jax.block_until_ready(out)
    assert out.shape == (bs, n, d_model)
    err = float(jnp.max(jnp.abs(out - ref)))
    assert jnp.allclose(out, ref, atol=2e-5, rtol=1e-4), f"f32 path max err {err}"

    # Streamed exp(pos) tiles (large-n codepath), still exact.
    out_s = aft_full_forward(x, wq, bq, wk, bk, wv, bv, pos, tq=tq,
                             use_bf16=False, resident_ep=False)
    out_s = jax.block_until_ready(out_s)
    err_s = float(jnp.max(jnp.abs(out_s - ref)))
    assert jnp.allclose(out_s, ref, atol=2e-5, rtol=1e-4), f"streamed-ep max err {err_s}"

    # Fast path (bf16 MXU operands, f32 accumulation, approx reciprocal).
    out_fast = aft_full_forward(x, wq, bq, wk, bk, wv, bv, pos, tq=tq, use_bf16=True)
    out_fast = jax.block_until_ready(out_fast)
    err_fast = float(jnp.max(jnp.abs(out_fast - ref)))
    assert jnp.allclose(out_fast, ref, atol=1e-3, rtol=5e-2), f"bf16 path max err {err_fast}"

    print("KERNEL_OK")
</pallas_src>

<mosaic_0001>
module attributes {stable_mosaic.version = 11 : i64} {
  func.func @_aft_full_kernel(%arg0: i32, %arg1: i32, %arg2: memref<16x16xf32, #tpu.memory_space<vmem>>, %arg3: memref<1x16x32xf32, #tpu.memory_space<vmem>>, %arg4: memref<32x384xf32, #tpu.memory_space<vmem>>, %arg5: memref<1x384xf32, #tpu.memory_space<vmem>>, %arg6: memref<1x8x128xf32, #tpu.memory_space<vmem>>, %arg7: memref<16x256xf32, #tpu.memory_space<vmem>>, %arg8: memref<16x128xf32, #tpu.memory_space<vmem>>) attributes {dimension_semantics = [#tpu.dimension_semantics<parallel>, #tpu.dimension_semantics<arbitrary>], iteration_bounds = array<i64: 2, 2>, scalar_prefetch = 0 : i64, scratch_operands = 2 : i64, tpu.core_type = #tpu.core_type<tc>, window_params = [{pipeline_mode = #tpu.pipeline_mode<synchronous>, transform_indices = @transform_0, window_bounds = array<i64: 16, 16>}, {transform_indices = @transform_1, window_bounds = array<i64: 1, 16, 32>}, {pipeline_mode = #tpu.pipeline_mode<synchronous>, transform_indices = @transform_2, window_bounds = array<i64: 32, 384>}, {pipeline_mode = #tpu.pipeline_mode<synchronous>, transform_indices = @transform_3, window_bounds = array<i64: 1, 384>}, {transform_indices = @transform_4, window_bounds = array<i64: 1, 8, 128>}]} {
    %c0_i32 = arith.constant 0 : i32
    %0 = arith.cmpi eq, %arg1, %c0_i32 : i32
    %1 = arith.extui %0 : i1 to i32
    %c0_i32_0 = arith.constant 0 : i32
    %2 = arith.cmpi ne, %1, %c0_i32_0 : i32
    scf.if %2 {
      %c0_7 = arith.constant 0 : index
      %c0_8 = arith.constant 0 : index
      %c0_9 = arith.constant 0 : index
      %18 = vector.load %arg3[%c0_7, %c0_8, %c0_9] : memref<1x16x32xf32, #tpu.memory_space<vmem>>, vector<1x16x32xf32>
      %19 = vector.shape_cast %18 : vector<1x16x32xf32> to vector<16x32xf32>
      %c0_10 = arith.constant 0 : index
      %c0_11 = arith.constant 0 : index
      %20 = vector.load %arg4[%c0_10, %c0_11] : memref<32x384xf32, #tpu.memory_space<vmem>>, vector<32x384xf32>
      %cst_12 = arith.constant dense<0.000000e+00> : vector<16x384xf32>
      %21 = tpu.matmul %19, %20, %cst_12 {dimension_numbers = #tpu.dot_dimension_numbers<[1], [0], [0], [1], [0, 0, 1, 1], [], []>} : vector<16x32xf32>, vector<32x384xf32>, vector<16x384xf32> -> vector<16x384xf32>
      %c0_13 = arith.constant 0 : index
      %c0_14 = arith.constant 0 : index
      %22 = vector.load %arg5[%c0_13, %c0_14] : memref<1x384xf32, #tpu.memory_space<vmem>>, vector<1x384xf32>
      %23 = vector.broadcast %22 : vector<1x384xf32> to vector<16x384xf32>
      %24 = arith.addf %21, %23 : vector<16x384xf32>
      %25 = vector.extract_strided_slice %24 {offsets = [0, 0], sizes = [16, 128], strides = [1, 1]} : vector<16x384xf32> to vector<16x128xf32>
      %26 = vector.extract_strided_slice %24 {offsets = [0, 128], sizes = [16, 128], strides = [1, 1]} : vector<16x384xf32> to vector<16x128xf32>
      %27 = vector.extract_strided_slice %24 {offsets = [0, 256], sizes = [16, 128], strides = [1, 1]} : vector<16x384xf32> to vector<16x128xf32>
      %28 = arith.negf %25 : vector<16x128xf32>
      %29 = math.exp %28 : vector<16x128xf32>
      %cst_15 = arith.constant 1.000000e+00 : f32
      %30 = vector.broadcast %cst_15 : f32 to vector<16x128xf32>
      %31 = arith.addf %30, %29 : vector<16x128xf32>
      %32 = arith.divf %30, %31 : vector<16x128xf32>
      %c0_16 = arith.constant 0 : index
      %c0_17 = arith.constant 0 : index
      %33 = vector.load %arg8[%c0_16, %c0_17] : memref<16x128xf32, #tpu.memory_space<vmem>>, vector<16x128xf32>
      tpu.vector_store %arg8[%c0_16, %c0_17], %32 {strides = array<i32>} : memref<16x128xf32, #tpu.memory_space<vmem>>, vector<16x128xf32>,
      %cst_18 = arith.constant dense<0xFF800000> : vector<128xf32>
      %34 = vector.multi_reduction <maximumf>, %26, %cst_18 [0] : vector<16x128xf32> to vector<128xf32>
      %35 = vector.shape_cast %34 : vector<128xf32> to vector<1x128xf32>
      %36 = vector.broadcast %35 : vector<1x128xf32> to vector<16x128xf32>
      %37 = arith.subf %26, %36 : vector<16x128xf32>
      %38 = math.exp %37 : vector<16x128xf32>
      %39 = arith.mulf %38, %27 : vector<16x128xf32>
      %c0_19 = arith.constant 0 : index
      %c0_20 = arith.constant 0 : index
      %40 = vector.load %arg7[%c0_19, %c0_20] : memref<16x256xf32, #tpu.memory_space<vmem>>, vector<16x128xf32>
      tpu.vector_store %arg7[%c0_19, %c0_20], %39 {strides = array<i32>} : memref<16x256xf32, #tpu.memory_space<vmem>>, vector<16x128xf32>,
      %c0_21 = arith.constant 0 : index
      %c128 = arith.constant 128 : index
      %41 = vector.load %arg7[%c0_21, %c128] : memref<16x256xf32, #tpu.memory_space<vmem>>, vector<16x128xf32>
      tpu.vector_store %arg7[%c0_21, %c128], %38 {strides = array<i32>} : memref<16x256xf32, #tpu.memory_space<vmem>>, vector<16x128xf32>,
    } else {
    }
    %c8_i32 = arith.constant 8 : i32
    %3 = arith.muli %arg1, %c8_i32 : i32
    %4 = tpu.assume_multiple %3, 8 : i32
    %5 = arith.index_cast %4 : i32 to index
    %c0 = arith.constant 0 : index
    %6 = vector.load %arg2[%5, %c0] : memref<16x16xf32, #tpu.memory_space<vmem>>, vector<8x16xf32>
    %7 = arith.index_cast %4 : i32 to index
    %c0_1 = arith.constant 0 : index
    %8 = vector.load %arg8[%7, %c0_1] : memref<16x128xf32, #tpu.memory_space<vmem>>, vector<8x128xf32>
    %c0_2 = arith.constant 0 : index
    %c0_3 = arith.constant 0 : index
    %9 = vector.load %arg7[%c0_2, %c0_3] : memref<16x256xf32, #tpu.memory_space<vmem>>, vector<16x256xf32>
    %cst = arith.constant dense<0.000000e+00> : vector<8x256xf32>
    %10 = tpu.matmul %6, %9, %cst {dimension_numbers = #tpu.dot_dimension_numbers<[1], [0], [0], [1], [0, 0, 1, 1], [], []>} : vector<8x16xf32>, vector<16x256xf32>, vector<8x256xf32> -> vector<8x256xf32>
    %11 = vector.extract_strided_slice %10 {offsets = [0, 0], sizes = [8, 128], strides = [1, 1]} : vector<8x256xf32> to vector<8x128xf32>
    %12 = vector.extract_strided_slice %10 {offsets = [0, 128], sizes = [8, 128], strides = [1, 1]} : vector<8x256xf32> to vector<8x128xf32>
    %13 = arith.divf %11, %12 : vector<8x128xf32>
    %14 = arith.mulf %8, %13 : vector<8x128xf32>
    %c0_4 = arith.constant 0 : index
    %c0_5 = arith.constant 0 : index
    %c0_6 = arith.constant 0 : index
    %15 = vector.load %arg6[%c0_4, %c0_5, %c0_6] : memref<1x8x128xf32, #tpu.memory_space<vmem>>, vector<1x8x128xf32>
    %16 = vector.shape_cast %15 : vector<1x8x128xf32> to vector<8x128xf32>
    %17 = vector.shape_cast %14 : vector<8x128xf32> to vector<1x8x128xf32>
    tpu.vector_store %arg6[%c0_4, %c0_5, %c0_6], %17 {strides = array<i32>} : memref<1x8x128xf32, #tpu.memory_space<vmem>>, vector<1x8x128xf32>,
    return
  }
  func.func @transform_0(%arg0: i32, %arg1: i32) -> (i32, i32) {
    %c0_i32 = arith.constant 0 : i32
    %c0_i32_0 = arith.constant 0 : i32
    %c0_i32_1 = arith.constant 0 : i32
    return %c0_i32, %c0_i32_0 : i32, i32
  }
  func.func @transform_1(%arg0: i32, %arg1: i32) -> (i32, i32, i32) {
    %c0_i32 = arith.constant 0 : i32
    %c0_i32_0 = arith.constant 0 : i32
    %c0_i32_1 = arith.constant 0 : i32
    return %arg0, %c0_i32, %c0_i32_0 : i32, i32, i32
  }
  func.func @transform_2(%arg0: i32, %arg1: i32) -> (i32, i32) {
    %c0_i32 = arith.constant 0 : i32
    %c0_i32_0 = arith.constant 0 : i32
    %c0_i32_1 = arith.constant 0 : i32
    return %c0_i32, %c0_i32_0 : i32, i32
  }
  func.func @transform_3(%arg0: i32, %arg1: i32) -> (i32, i32) {
    %c0_i32 = arith.constant 0 : i32
    %c0_i32_0 = arith.constant 0 : i32
    %c0_i32_1 = arith.constant 0 : i32
    return %c0_i32, %c0_i32_0 : i32, i32
  }
  func.func @transform_4(%arg0: i32, %arg1: i32) -> (i32, i32, i32) {
    %c0_i32 = arith.constant 0 : i32
    %c0_i32_0 = arith.constant 0 : i32
    return %arg0, %arg1, %c0_i32 : i32, i32, i32
  }
}

</mosaic_0001>

<bundles_post_ra>
// kernel: aft_full_forward.1
= control target key start
LH: loop header
LB: loop body
LE: loop exit
PB: predicated region body
PF: predicated region fallthrough
CT: control target
= control target key end

     0   :  { %9 = vsyncpa [#allocation5], 0  ;;  %s1086_s0 = inlined_call_operand.vmem [shape: f32[16,16], index: 0, kind: input, shape index: {}]   ;;  %s1087_s1 = inlined_call_operand.vmem [shape: f32[2,16,32], index: 1, kind: input, shape index: {}]   ;;  %s1088_s2 = inlined_call_operand.vmem [shape: f32[32,384], index: 2, kind: input, shape index: {}]   ;;  %s1089_s3 = inlined_call_operand.vmem [shape: f32[1,384], index: 3, kind: input, shape index: {}]   ;;  %s1090_s4 = inlined_call_operand.hbm [shape: f32[2,16,128], index: 4, kind: output, shape index: {}]  }
   0x1   :  { %11 = vsyncpa [#allocation5 + $0x1], 0  ;;  %s888_s15 = smov 0   ;;  %s890_s16 = smov 0  }
   0x2   :  { %s892_s17 = smov 0   ;;  %s894_s18 = smov 0  }
   0x3   :  { %s896_s19 = smov 0   ;;  %s898_s20 = smov 0  }
   0x4   :  { %s900_s21 = smov 0   ;;  %s902_s22 = smov 0  }
   0x5 LB: > { %s617_s23 = sadd.s32 4294967295, %s858_s22   ;;  %s618_s24 = sadd.s32 4294967294, %s858_s22   ;;  %s858_s22 = sphi %s902_s22, %s17_s22   ;;  %s854_s21 = sphi %s900_s21, %s1101_s21   ;;  %s850_s20 = sphi %s898_s20, %s1100_s20   ;;  %s846_s19 = sphi %s896_s19, %s1099_s19   ;;  %s842_s18 = sphi %s894_s18, %s1098_s18   ;;  %s838_s17 = sphi %s892_s17, %s1097_s17   ;;  %s834_s16 = sphi %s890_s16, %s1096_s16   ;;  %s830_s15 = sphi %s888_s15, %s1095_s15  }
   0x6   : > { %s26_s25 = sadd.s32 1, %s850_s20  ;;  %s29_s26 = sadd.s32 1, %s854_s21 }
   0x7   : > { %p27_p0 = scmp.ge.s32.totalorder %s26_s25, 2  ;;  %p137_p1 = scmp.ne.s32.totalorder %s838_s17, %s834_s16 }
   0x8   : > { %p138_p2 = scmp.eq.s32.totalorder %s617_s23, 3  ;;  %p143_p5 = scmp.ne.s32.totalorder %s834_s16, %s830_s15 }
   0x9   : > { %s1103_s25 = smov (%p27_p0, %s26_s25), 0  ;;  %s1105_s26 = smov (!%p27_p0, %s29_s26), %s854_s21 }
   0xa   : > { %s123_s27 = ssub.s32 %s850_s20, %s1103_s25  ;;  %p939_p3 = por %p138_p2, %p137_p1 }
   0xb   : > { %p31_p4 = scmp.ge.s32.totalorder %s1105_s26, 2  ;;  %p144_p6 = scmp.eq.s32.totalorder %s618_s24, 3 }
   0xc   : > { %p621_p7 = scmp.ge.s32.totalorder %s858_s22, 1  ;;  %p179_p9 = scmp.lt.s32.totalorder %s858_s22, 5 }
   0xd   : > { %s1107_s26 = smov (%p31_p4, %s1105_s26), 0  ;;  %p948_p8 = por %p144_p6, %p143_p5 }
   0xe   : > { %s122_s30 = ssub.s32 %s854_s21, %s1107_s26  ;;  %s127_s5 = sadd.s32 1, %s838_s17 }
   0xf   : > { %s124_s6 = sor.u32 %s123_s27, %s122_s30  ;;  %p180_p10 = pnand %p621_p7, %p179_p9 }
  0x10   : > { %p125_p11 = scmp.eq.s32.totalorder %s124_s6, 0  ;;  %s1091_s8 = sand.u32 (!%p180_p10), 1, %s834_s16  }
  0x11   : > { %183 = sbr.rel (%p180_p10) target bundleno = 542 (0x21e), region = 36  ;;  %p205_p12 = scmp.lt.s32.totalorder (!%p180_p10), %s846_s19, 1 }
  0x12   : > { %s957_s7 = scalar_select %p125_p11, %s838_s17, %s127_s5  }
  0x13   : > { %s963_s9 = sshll.u32 (!%p180_p10), %s1091_s8, 3  ;;  %p625_p13 = scmp.ne.s32.totalorder (!%p180_p10), %s842_s18, 0 }
  0x14   : > { %s204_s23 = scalar_lea.vmem (!%p180_p10), [#allocation4], %s963_s9 }
  0x18   : > { %s206_s10 = scalar_select %p205_p12, %s846_s19, 1 }
  0x19   : > { %213 = sbr.rel (%p625_p13) target bundleno = 288 (0x120), region = 40  ;;  %v217_v0 = vld [vmem:[%s1088_s2 + $0x8] sm:$0xff] (!%p625_p13)  ;;  %v220_v1 = vld [vmem:[%s1088_s2 + $0x20] sm:$0xff] (!%p625_p13)  ;;  %v219_v4 = vld [vmem:[%s1088_s2 + $0x18] sm:$0xff] (!%p625_p13)  ;;  %v860_v7 = vmov (!%p625_p13), 0.0   ;;  %vm245_vm0 = vcmask (!%p625_p13), 261120   ;;  %v230_v21 = vlaneseq (!%p625_p13) }
  0x1a   : > { %s639_s11 = sshll.u32 %s206_s10, 4  ;;  %v216_v2 = vld [vmem:[%s1088_s2] sm:$0xff] (!%p625_p13)  ;;  %v657_v3 = vpack.c.bf16 (!%p625_p13), %v220_v1, %v217_v0  ;;  %v223_v5 = vld [vmem:[%s1088_s2 + $0x38] sm:$0xff] (!%p625_p13)  ;;  %v226_v6 = vld [vmem:[%s1088_s2 + $0x50] sm:$0xff] (!%p625_p13)  ;;  %316 = vmatprep.mubr.f32.mxu0 (!%p625_p13), %v860_v7 }
  0x1b   : > { %s969_s14 = scalar_lea.vmem %s1087_s1, %s639_s11  ;;  %v659_v8 = vpack.c.bf16 (!%p625_p13), %v219_v4, %v216_v2  ;;  %v661_v9 = vpack.c.bf16 (!%p625_p13), %v226_v6, %v223_v5  ;;  %v222_v10 = vld [vmem:[%s1088_s2 + $0x30] sm:$0xff] (!%p625_p13)  ;;  %v225_v11 = vld [vmem:[%s1088_s2 + $0x48] sm:$0xff] (!%p625_p13)  ;;  %v224_v17 = vld [vmem:[%s1088_s2 + $0x40] sm:$0xff] (!%p625_p13)  ;;  %v231_v22 = vshrl.u32 (!%p625_p13), %v230_v21, 7 }
  0x1c   : > { %v214_v12 = vld [vmem:[%s969_s14] sm:$0xff] (!%p625_p13)  ;;  %658 = vmatprep.subr.bf16.mxu0 (!%p625_p13), %v657_v3  ;;  %v218_v13 = vld [vmem:[%s1088_s2 + $0x10] sm:$0xff] (!%p625_p13)  ;;  %v221_v14 = vld [vmem:[%s1088_s2 + $0x28] sm:$0xff] (!%p625_p13)  ;;  %v663_v15 = vpack.c.bf16 (!%p625_p13), %v225_v11, %v222_v10 }
  0x1d   : > { %654 = vmatprep.mubr.msk.f32.mxu1 (!%p625_p13), %vm245_vm0, %v214_v12  ;;  %660 = vmatpush1.bf16.msra.mxu0 (!%p625_p13), %v659_v8  ;;  %v665_v16 = vpack.c.bf16 (!%p625_p13), %v221_v14, %v218_v13  ;;  %v227_v18 = vld [vmem:[%s1088_s2 + $0x58] sm:$0xff] (!%p625_p13)  ;;  %v215_v20 = vld [vmem:[%s969_s14 + $0x8] sm:$0xff] (!%p625_p13)  ;;  %v232_v23 = vsub.s32 (!%p625_p13), 0, %v231_v22  ;;  %v228_v24 = vld [vmem:[%s1089_s3] sm:$0x7] (!%p625_p13)  ;;  %v236_v26 = vsub.s32 (!%p625_p13), 1, %v231_v22 }
  0x1e   : > { %662 = vmatprep.subr.bf16.mxu0 (!%p625_p13), %v661_v9  ;;  %v669_v19 = vpack.c.bf16 (!%p625_p13), %v227_v18, %v224_v17  ;;  %v240_v55 = vsub.s32 (!%p625_p13), 2, %v231_v22 }
  0x1f   : > { %666 = vmatprep.subr.bf16.mxu1 (!%p625_p13), %v665_v16  ;;  %v233_v25 = vrot.slane (!%p625_p13), %v228_v24, %v232_v23  ;;  %v237_v30 = vrot.slane (!%p625_p13), %v228_v24, %v236_v26 }
  0x20   : > { %668 = vmatpush3.bf16.msra.mxu1 %v665_v16  ;;  %v241_v57 = vrot.slane %v228_v24, %v240_v55 }
  0x21   : > { %664 = vmatpush1.bf16.msra.mxu0 %v663_v15  ;;  %670 = vmatprep.subr.bf16.mxu1 %v669_v19 }
  0x24   : > { %626 = vmatmul.mubr.msk.f32.vlgmr.msra.gmra.mrb[0].mxu0 %vm245_vm0, %v214_v12  ;;  %672 = vmatpush3.bf16.msra.mxu1 %v669_v19 }
  0x25   : > { %322 = vmatprep.mubr.f32.mxu0 %v860_v7 }
  0x27   : > { %655 = vmatmul.mubr.msk.f32.vlgmr.msra.gmra.mrb[0].mxu1 %vm245_vm0, %v215_v20 }
  0x28   : > { %627 = vmatmul.mubr.msk.f32.gmra.mrb[2].mxu0 %vm245_vm0, %v215_v20 }
  0xf7   : > { %v318_v27 = vpop.f32.mrb[0].mxu0 }
  0xf8   : > { %v319_v28 = vadd.f32 %v318_v27, %v233_v25  ;;  %v320_v29 = vpop.f32.mrb[1].mxu0 }
  0xf9   : > { %v321_v37 = vadd.f32 %v320_v29, %v237_v30 }
  0xfa   : > { %v630_v31 = vmul.f32 -1.442695, %v319_v28  ;;  %v656_v32 = vpop.f32.mrb[0].mxu1 }
  0xfb   : > { %v324_v33 = vpop.f32.mrb[2].mxu0  ;;  %v395_v34 = vpop.f32.mrb[1].mxu1  ;;  %v401_v60 = vadd.f32 %v656_v32, %v241_v57 }
  0xfc   : > { %750 = vpow2.f32 %v630_v31  ;;  %v325_v35 = vadd.f32 %v324_v33, %v233_v25  ;;  %v326_v36 = vpop.f32.mrb[3].mxu0  ;;  %v396_v59 = vadd.f32 %v395_v34, %v241_v57 }
  0xfd   : > { %v327_v38 = vadd.f32 %v326_v36, %v237_v30 }
  0xfe   : > { %v631_v39 = vmul.f32 -1.442695, %v325_v35 }
  0xff   : > { %v418_v40 = vmax.f32 %v321_v37, %v327_v38 }
 0x100   : > { %752 = vpow2.f32 %v631_v39 }
 0x101   : > { %v419_v41 = vrot.slane %v418_v40, 4 }
 0x103   : > { %v420_v42 = vmax.f32 %v418_v40, %v419_v41 }
 0x105   : > { %v421_v43 = vrot.slane %v420_v42, 2 }
 0x106   : > { %v751_v44 = vpop.eup %750 }
 0x107   : > { %v410_v45 = vadd.f32 1.0, %v751_v44  ;;  %v422_v46 = vmax.f32 %v420_v42, %v421_v43 }
 0x109   : > { %754 = vrcp.f32 %v410_v45  ;;  %v423_v47 = vrot.slane %v422_v46, 1 }
 0x10a   : > { %v753_v48 = vpop.eup %752 }
 0x10b   : > { %v411_v49 = vadd.f32 1.0, %v753_v48  ;;  %v424_v50 = vmax.f32 %v422_v46, %v423_v47 }
 0x10d   : > { %756 = vrcp.f32 %v411_v49  ;;  %v425_v51 = vsub.f32 %v321_v37, %v424_v50  ;;  %v426_v52 = vsub.f32 %v327_v38, %v424_v50 }
 0x10f   : > { %v427_v53 = vmul.f32 1.442695, %v425_v51  ;;  %v429_v54 = vmul.f32 1.442695, %v426_v52 }
 0x111   : > { %758 = vpow2.f32 %v427_v53 }
 0x112   : > { %760 = vpow2.f32 %v429_v54 }
 0x113   : > { %v755_v56 = vpop.eup %754 }
 0x114   : > { %416 = vst [vmem:[#allocation3] sm:$0xff] %v755_v56 }
 0x117   : > { %v757_v58 = vpop.eup %756 }
 0x118   : > { %417 = vst [vmem:[#allocation3 + $0x8] sm:$0xff] %v757_v58 }
 0x11b   : > { %v759_v61 = vpop.eup %758 }
 0x11c   : > { %v761_v62 = vpop.eup %760  ;;  %435 = vst [vmem:[#allocation2 + $0x8] sm:$0xff] %v759_v61  ;;  %v431_v63 = vmul.f32 %v759_v61, %v396_v59 }
 0x11d   : > { %436 = vst [vmem:[#allocation2 + $0x18] sm:$0xff] %v761_v62  ;;  %v432_v0 = vmul.f32 %v761_v62, %v401_v60 }
 0x11e   : > { %433 = vst [vmem:[#allocation2] sm:$0xff] %v431_v63 }
 0x11f   : > { %434 = vst [vmem:[#allocation2 + $0x10] sm:$0xff] %v432_v0 }
 0x120 PF: > { %s632_s14 = sshll.u32 %s842_s18, 3  ;;  %v861_v6 = vmov 0.0   ;;  %vm446_vm1 = vcmask 130048   ;;  %s635_s13 = sshll.u32 %s846_s19, 1 }
 0x121   : > { %514 = vmatprep.mubr.f32.mxu0 %v861_v6  ;;  %s438_s12 = scalar_lea.vmem %s1086_s0, %s632_s14  ;;  %s537_s24 = sadd.s32 %s842_s18, %s635_s13 }
 0x122   : > { %v439_v8 = vld [vmem:[%s438_s12] sm:$0xff]  ;;  %s440_s27 = scalar_lea.vmem [#allocation3], %s632_s14  ;;  %s636_s30 = sshll.u32 %s537_s24, 7 }
 0x123   : > { %v443_v1 = vld [vmem:[#allocation2 + $0x8] sm:$0xff]  ;;  %v441_v12 = vld [vmem:[%s440_s27] sm:$0xff]  ;;  %s541_s5 = sshll.u32 %s204_s23, 4  ;;  %s1029_s8 = scalar_lea.hbm %s1090_s4, %s636_s30  ;;  %s1031_s5 = int_to_ptr.vmem [resolvable:$true] %s541_s5 }
 0x124   : > { %v445_v2 = vld [vmem:[#allocation2 + $0x18] sm:$0xff]  ;;  %s1094_s18 = sand.u32 1, %s834_s16   ;;  %s764_s14 = scalar_lea.vmem %s1031_s5, 128 }
 0x125   : > { %v442_v3 = vld [vmem:[#allocation2] sm:$0xff]  ;;  %v673_v4 = vpack.c.bf16 %v445_v2, %v443_v1  ;;  %s526_s19 = scalar_lea.sflag [#allocation5], %s1094_s18  ;;  %p765_p0 = scmp.ne.s32.totalorder %s1031_s5, %s764_s14 }
 0x126   : > { %v444_v5 = vld [vmem:[#allocation2 + $0x10] sm:$0xff]  ;;  %s862_s11 = smov [#allocation4]  }
 0x127   : > { %v675_v7 = vpack.c.bf16 %v444_v5, %v442_v3  ;;  %674 = vmatprep.subr.bf16.mxu0 %v673_v4  ;;  %p766_p1 = pnand %p765_p0, %p939_p3  ;;  %s768_s12 = sshll.u32 %s862_s11, 4  ;;  %s769_s12 = int_to_ptr.vmem [resolvable:$false] %s768_s12 }
 0x128   : > { %s770_s13 = scalar_lea.vmem %s769_s12, 256  ;;  %p771_p4 = scmp.lt.s32.totalorder %s1031_s5, %s769_s12 }
 0x129   : > { %676 = vmatpush1.bf16.msra.mxu0 %v675_v7  ;;  %p767_p2 = pneg %p766_p1  ;;  %p772_p5 = scmp.lt.s32.totalorder %s770_s13, %s764_s14 }
 0x12b   : > { %p773_p6 = por %p772_p5, %p771_p4 }
 0x12c   : > { %633 = vmatmul.mubr.msk.f32.vlgmr.msra.gmra.mrb[0].mxu0 %vm446_vm1, %v439_v8 }
 0x12d   : > { %p774_p7 = pnand %p773_p6, %p767_p2 }
 0x1ff   : > { %v516_v9 = vpop.f32.mrb[0].mxu0 }
 0x200   : > { %v518_v10 = vpop.f32.mrb[1].mxu0 }
 0x201   : > { %762 = vrcp.f32 %v518_v10 }
 0x20b   : > { %v763_v11 = vpop.eup %762 }
 0x20c   : > { %v522_v13 = vmul.f32 %v763_v11, %v516_v9 }
 0x20e   : > { %v523_v14 = vmul.f32 %v522_v13, %v441_v12 }
 0x210   : > { %524 = vst [vmem:[%s204_s23] sm:$0xff] %v523_v14 }
 0x211   : > { %777 = shalt.err (!%p774_p7)
}
 0x212   : > { %s778_s9 = scalar_lea.hbm %s1029_s8, 128  ;;  %s782_s27 = scalar_lea.hbm %s1090_s4, 512 }
 0x213   : > { %p779_p9 = scmp.ne.s32.totalorder %s1029_s8, %s778_s9  ;;  %p783_p12 = scmp.lt.u32.totalorder %s1029_s8, %s1090_s4 }
 0x214   : > { %p784_p13 = scmp.lt.u32.totalorder %s782_s27, %s778_s9  ;;  %p786_p1 = scmp.lt.u32.totalorder %s778_s9, %s1029_s8 }
 0x215   : > { %p780_p10 = pnand %p779_p9, %p939_p3 }
 0x216   : > { %p785_p0 = por %p784_p13, %p783_p12 }
 0x217   : > { %p781_p11 = pneg %p780_p10 }
 0x218   : > { %p787_p2 = por %p786_p1, %p785_p0 }
 0x21a   : > { %p788_p4 = pnand %p787_p2, %p781_p11 }
 0x21c   : > { %791 = shalt.err (!%p788_p4)
}
 0x21d   : > { %677 = dma.vmem_to_hbm [thread:$0]  (%p939_p3), %s1031_s5, 128, %s1029_s8, %s526_s19  }
 0x21e PF: > { %p683_p5 = scmp.ge.s32.totalorder %s858_s22, 2  ;;  %s553_s10 = sand.u32 1, %s830_s15  }
 0x21f   : > { %s554_s18 = scalar_lea.sflag [#allocation5], %s553_s10 }
 0x220   : > { %p680_p6 = pnand %p683_p5, %p948_p8 }
 0x222   : > { %825 = dma.done.wait (!%p680_p6), %s554_s18, 128  }
 0x223   : > { %827 = vsyncadd (!%p680_p6), %s554_s18, 4294967168  ;;  %s17_s22 = sadd.s32 1, %s858_s22   ;;  %s1095_s15 = smov %s834_s16 }
 0x224   : > { %p14_p7 = scmp.ge.s32.totalorder %s17_s22, 6   ;;  %s1096_s16 = smov %s838_s17 }
 0x225   : > { %s1097_s17 = smov %s957_s7  ;;  %s1098_s18 = smov %s850_s20 }
 0x226   : > { %s1099_s19 = smov %s854_s21  ;;  %s1100_s20 = smov %s1103_s25 }
 0x227   : > { %s1101_s21 = smov %s1107_s26  ;;  %16 = sbr.rel (!%p14_p7) target bundleno = 5 (0x5), region = 77 }
 0x22e   :  { %559 = vsyncpa [#allocation5], 1 }
 0x22f   :  { %561 = vsyncpa [#allocation5 + $0x1], 1 }

</bundles_post_ra>
